<compile_context>
chip_gen: v6e
topology: v6e:2x2x1
jax: 0.10.0
libtpu: 0.0.40
codegen_flags: <defaults>
</compile_context>

<pallas_src>
import jax
import jax.numpy as jnp
from jax.experimental import pallas as pl
from jax.experimental.pallas import tpu as pltpu


def _round_up(x, m):
    return (x + m - 1) // m * m


def linear_kernel(x_ref, w_ref, b_ref, o_ref):
    # One batch tile: (tm, K) @ (K, N_pad) + (1, N_pad) -> (tm, N_pad) on the MXU.
    acc = jnp.dot(x_ref[...], w_ref[...], preferred_element_type=jnp.float32)
    o_ref[...] = (acc + b_ref[...]).astype(o_ref.dtype)


def _linear_pallas(x_p, w_p, b_p, tm):
    B_pad, K = x_p.shape
    _, N_pad = w_p.shape
    itemsize = jnp.dtype(x_p.dtype).itemsize
    cost = pl.CostEstimate(
        flops=2 * B_pad * K * N_pad,
        transcendentals=0,
        bytes_accessed=(x_p.size + w_p.size + b_p.size + B_pad * N_pad) * itemsize,
    )
    return pl.pallas_call(
        linear_kernel,
        out_shape=jax.ShapeDtypeStruct((B_pad, N_pad), x_p.dtype),
        grid=(B_pad // tm,),
        in_specs=[
            # x: tiled over batch, double-buffered against compute.
            pl.BlockSpec((tm, K), lambda i: (i, 0)),
            # W_t: grid-invariant -> DMA'd once, VMEM-resident across all tiles.
            pl.BlockSpec((K, N_pad), lambda i: (0, 0)),
            # bias: grid-invariant, full-array block (1, N_pad).
            pl.BlockSpec((1, N_pad), lambda i: (0, 0)),
        ],
        out_specs=pl.BlockSpec((tm, N_pad), lambda i: (i, 0)),
        compiler_params=pltpu.CompilerParams(
            dimension_semantics=("parallel",),  # batch axis safe for megacore split
        ),
        cost_estimate=cost,
    )(x_p, w_p, b_p)


def make_simple_model_forward(weight, bias, *, tm_max=512):
    """Builds the jitted forward for torch-layout params.

    weight: [out_features, in_features], bias: [out_features]
    Returns f(x: [B, in_features]) -> [B, out_features], i.e. x @ W.T + b.
    """
    N, K = weight.shape
    # Lane-dense output: pad N (30) up to a multiple of 128 so stores are
    # full-vreg `vst`s instead of masked partial stores.
    N_pad = _round_up(max(N, 128), 128)
    # One-time parameter prep (transpose + pad), hoisted out of the forward.
    w_p = jnp.pad(weight.T, ((0, 0), (0, N_pad - N)))             # [K, N_pad]
    b_p = jnp.pad(bias.reshape(1, -1), ((0, 0), (0, N_pad - N)))  # [1, N_pad]

    def forward(x):
        B = x.shape[0]
        # Sublane-aligned batch tile; cap so x/y tiles stay far below scoped
        # VMEM even on v7x (64 MiB physical / 32 MiB scoped default).
        tm = min(_round_up(B, 8), tm_max)
        B_pad = _round_up(B, tm)
        x_p = x if B_pad == B else jnp.pad(x, ((0, B_pad - B), (0, 0)))
        y_p = _linear_pallas(x_p, w_p, b_p, tm)
        # Strip batch / lane padding back off.
        return y_p[:B, :N]

    return jax.jit(forward)


if __name__ == "__main__":
    input_size = 768
    output_size = 30
    batch = 8

    key = jax.random.PRNGKey(0)
    k_x, k_w, k_b = jax.random.split(key, 3)

    # Deterministic parameter init mimicking torch.nn.Linear default
    # (uniform in [-1/sqrt(fan_in), 1/sqrt(fan_in)]).
    bound = 1.0 / (input_size ** 0.5)
    weight = jax.random.uniform(k_w, (output_size, input_size), jnp.float32, -bound, bound)
    bias = jax.random.uniform(k_b, (output_size,), jnp.float32, -bound, bound)
    x = jax.random.normal(k_x, (batch, input_size), jnp.float32)

    fwd = make_simple_model_forward(weight, bias)
    y = jax.block_until_ready(fwd(x))

    # Reference check against plain JAX (same math as torch's x @ W.T + b).
    y_ref = x @ weight.T + bias[None, :]
    assert y.shape == (batch, output_size)
    assert jnp.allclose(y, y_ref, atol=1e-4, rtol=1e-4)

    print("KERNEL_OK")
</pallas_src>

<mosaic_0001>
module attributes {stable_mosaic.version = 11 : i64} {
  func.func @linear_kernel(%arg0: i32, %arg1: memref<8x768xf32, #tpu.memory_space<vmem>>, %arg2: memref<768x128xf32, #tpu.memory_space<vmem>>, %arg3: memref<1x128xf32, #tpu.memory_space<vmem>>, %arg4: memref<8x128xf32, #tpu.memory_space<vmem>>) attributes {dimension_semantics = [#tpu.dimension_semantics<parallel>], iteration_bounds = array<i64: 1>, scalar_prefetch = 0 : i64, scratch_operands = 0 : i64, tpu.core_type = #tpu.core_type<tc>, window_params = [{transform_indices = @transform_0, window_bounds = array<i64: 8, 768>}, {pipeline_mode = #tpu.pipeline_mode<synchronous>, transform_indices = @transform_1, window_bounds = array<i64: 768, 128>}, {pipeline_mode = #tpu.pipeline_mode<synchronous>, transform_indices = @transform_2, window_bounds = array<i64: 1, 128>}, {transform_indices = @transform_3, window_bounds = array<i64: 8, 128>}]} {
    %c0 = arith.constant 0 : index
    %c0_0 = arith.constant 0 : index
    %0 = vector.load %arg1[%c0, %c0_0] : memref<8x768xf32, #tpu.memory_space<vmem>>, vector<8x768xf32>
    %c0_1 = arith.constant 0 : index
    %c0_2 = arith.constant 0 : index
    %1 = vector.load %arg2[%c0_1, %c0_2] : memref<768x128xf32, #tpu.memory_space<vmem>>, vector<768x128xf32>
    %cst = arith.constant dense<0.000000e+00> : vector<8x128xf32>
    %2 = tpu.matmul %0, %1, %cst {dimension_numbers = #tpu.dot_dimension_numbers<[1], [0], [0], [1], [0, 0, 1, 1], [], []>} : vector<8x768xf32>, vector<768x128xf32>, vector<8x128xf32> -> vector<8x128xf32>
    %c0_3 = arith.constant 0 : index
    %c0_4 = arith.constant 0 : index
    %3 = vector.load %arg3[%c0_3, %c0_4] : memref<1x128xf32, #tpu.memory_space<vmem>>, vector<1x128xf32>
    %4 = vector.broadcast %3 : vector<1x128xf32> to vector<8x128xf32>
    %5 = arith.addf %2, %4 : vector<8x128xf32>
    %c0_5 = arith.constant 0 : index
    %c0_6 = arith.constant 0 : index
    %6 = vector.load %arg4[%c0_5, %c0_6] : memref<8x128xf32, #tpu.memory_space<vmem>>, vector<8x128xf32>
    tpu.vector_store %arg4[%c0_5, %c0_6], %5 {strides = array<i32>} : memref<8x128xf32, #tpu.memory_space<vmem>>, vector<8x128xf32>,
    return
  }
  func.func @transform_0(%arg0: i32) -> (i32, i32) {
    %c0_i32 = arith.constant 0 : i32
    %c0_i32_0 = arith.constant 0 : i32
    return %arg0, %c0_i32 : i32, i32
  }
  func.func @transform_1(%arg0: i32) -> (i32, i32) {
    %c0_i32 = arith.constant 0 : i32
    %c0_i32_0 = arith.constant 0 : i32
    %c0_i32_1 = arith.constant 0 : i32
    return %c0_i32, %c0_i32_0 : i32, i32
  }
  func.func @transform_2(%arg0: i32) -> (i32, i32) {
    %c0_i32 = arith.constant 0 : i32
    %c0_i32_0 = arith.constant 0 : i32
    %c0_i32_1 = arith.constant 0 : i32
    return %c0_i32, %c0_i32_0 : i32, i32
  }
  func.func @transform_3(%arg0: i32) -> (i32, i32) {
    %c0_i32 = arith.constant 0 : i32
    %c0_i32_0 = arith.constant 0 : i32
    return %arg0, %c0_i32 : i32, i32
  }
}

</mosaic_0001>

<bundles_post_ra>
// kernel: forward.1
= control target key start
LH: loop header
LB: loop body
LE: loop exit
PB: predicated region body
PF: predicated region fallthrough
CT: control target
= control target key end

     0   :  { %8 = vsyncpa [#allocation3], 0  ;;  %s591_s0 = inlined_call_operand.hbm [shape: f32[8,768], index: 0, kind: input, shape index: {}]   ;;  %s592_s1 = inlined_call_operand.hbm [shape: f32[768,128], index: 1, kind: input, shape index: {}]   ;;  %s593_s2 = inlined_call_operand.vmem [shape: f32[1,128], index: 2, kind: input, shape index: {}]   ;;  %s594_s3 = inlined_call_operand.hbm [shape: f32[8,128], index: 3, kind: output, shape index: {}]  }
   0x1   :  { %9 = vsyncpa [#allocation6], 0 }
   0x2   :  { %10 = vsyncpa [#allocation4], 0  ;;  %s554_s12 = smov [#allocation2]   ;;  %s555_s14 = smov [#allocation5]  }
   0x3   :  { %s17_s13 = sshll.u32 %s554_s12, 4  ;;  %s26_s15 = sshll.u32 %s555_s14, 4  ;;  %s18_s13 = int_to_ptr.vmem [resolvable:$true] %s17_s13  ;;  %s27_s15 = int_to_ptr.vmem [resolvable:$true] %s26_s15 }
   0x4   :  { %s496_s16 = scalar_lea.vmem %s18_s13, 768  ;;  %p501_p1 = scmp.lt.s32.totalorder %s18_s13, %s18_s13 }
   0x5   :  { %p497_p0 = scmp.ne.s32.totalorder %s18_s13, %s496_s16  ;;  %p502_p2 = scmp.lt.s32.totalorder %s496_s16, %s496_s16 }
   0x7   :  { %p503_p3 = por %p502_p2, %p501_p1 }
   0x9   :  { %p504_p4 = pnand %p503_p3, %p497_p0 }
   0xb   :  { %507 = shalt.err (!%p504_p4)
}
   0xc   :  { %20 = dma.hbm_to_vmem [thread:$0]  %s591_s0, 768, %s18_s13, [#allocation3]  }
   0xd   :  { %s516_s19 = scalar_lea.vmem %s27_s15, 12288  ;;  %p521_p6 = scmp.lt.s32.totalorder %s27_s15, %s27_s15 }
   0xe   :  { %p517_p5 = scmp.ne.s32.totalorder %s27_s15, %s516_s19  ;;  %p522_p7 = scmp.lt.s32.totalorder %s516_s19, %s516_s19 }
  0x10   :  { %p523_p8 = por %p522_p7, %p521_p6 }
  0x12   :  { %p524_p9 = pnand %p523_p8, %p517_p5 }
  0x14   :  { %527 = shalt.err (!%p524_p9)
}
  0x15   :  { %s556_s20 = smov 128   ;;  %s557_s21 = smov 8  }
  0x16   :  { %32 = dma.hbm_to_vmem [thread:$0]  %s592_s1, 12288, %s27_s15, [#allocation6], %s556_s20, %s556_s20, %s557_s21  }
  0x17   :  { %548 = dma.done.wait [#allocation3], 768  }
  0x18   :  { %549 = vsyncadd [#allocation3], 4294966528 }
  0x19   :  { %550 = dma.done.wait [#allocation6], 12288  }
  0x1a   :  { %551 = vsyncadd [#allocation6], 4294955008  ;;  %v78_v0 = vld [vmem:[#allocation5 + $0xf8] sm:$0xff]  ;;  %v77_v2 = vld [vmem:[#allocation5 + $0xf0] sm:$0xff]  ;;  %s558_s24 = smov [#allocation7]  }
  0x1b   :  { %v62_v1 = vld [vmem:[#allocation5 + $0x78] sm:$0xff]  ;;  %378 = vmatprep.subr.mxu0 %v78_v0  ;;  %v61_v4 = vld [vmem:[#allocation5 + $0x70] sm:$0xff]  ;;  %v76_v6 = vld [vmem:[#allocation5 + $0xe8] sm:$0xff]  ;;  %s367_s25 = sshll.u32 %s558_s24, 4  ;;  %s368_s25 = int_to_ptr.vmem [resolvable:$true] %s367_s25 }
  0x1c   :  { %v110_v3 = vld [vmem:[#allocation5 + $0x1f8] sm:$0xff]  ;;  %379 = vmatpush3.msra.mxu0 %v62_v1  ;;  %v109_v7 = vld [vmem:[#allocation5 + $0x1f0] sm:$0xff]  ;;  %v60_v8 = vld [vmem:[#allocation5 + $0x68] sm:$0xff]  ;;  %s528_s26 = scalar_lea.vmem %s368_s25, 128  ;;  %p533_p11 = scmp.lt.s32.totalorder %s368_s25, %s368_s25 }
  0x1d   :  { %v94_v5 = vld [vmem:[#allocation5 + $0x178] sm:$0xff]  ;;  %413 = vmatprep.subr.mxu1 %v110_v3  ;;  %380 = vmatprep.subr.mxu0 %v77_v2  ;;  %v93_v9 = vld [vmem:[#allocation5 + $0x170] sm:$0xff]  ;;  %v108_v10 = vld [vmem:[#allocation5 + $0x1e8] sm:$0xff]  ;;  %p529_p10 = scmp.ne.s32.totalorder %s368_s25, %s528_s26  ;;  %p534_p12 = scmp.lt.s32.totalorder %s528_s26, %s528_s26 }
  0x1e   :  { %414 = vmatpush3.msra.mxu1 %v94_v5  ;;  %381 = vmatpush3.msra.mxu0 %v61_v4  ;;  %v75_v11 = vld [vmem:[#allocation5 + $0xe0] sm:$0xff]  ;;  %v92_v12 = vld [vmem:[#allocation5 + $0x168] sm:$0xff]  ;;  %v74_v15 = vld [vmem:[#allocation5 + $0xd8] sm:$0xff] }
  0x1f   :  { %415 = vmatprep.subr.mxu1 %v109_v7  ;;  %382 = vmatprep.subr.mxu0 %v76_v6  ;;  %v59_v13 = vld [vmem:[#allocation5 + $0x60] sm:$0xff]  ;;  %v58_v17 = vld [vmem:[#allocation5 + $0x58] sm:$0xff]  ;;  %v73_v19 = vld [vmem:[#allocation5 + $0xd0] sm:$0xff]  ;;  %p535_p13 = por %p534_p12, %p533_p11 }
  0x20   :  { %416 = vmatpush3.msra.mxu1 %v93_v9  ;;  %v107_v14 = vld [vmem:[#allocation5 + $0x1e0] sm:$0xff]  ;;  %383 = vmatpush3.msra.mxu0 %v60_v8  ;;  %v106_v18 = vld [vmem:[#allocation5 + $0x1d8] sm:$0xff]  ;;  %v57_v21 = vld [vmem:[#allocation5 + $0x50] sm:$0xff] }
  0x21   :  { %417 = vmatprep.subr.mxu1 %v108_v10  ;;  %v91_v16 = vld [vmem:[#allocation5 + $0x160] sm:$0xff]  ;;  %384 = vmatprep.subr.mxu0 %v75_v11  ;;  %v90_v20 = vld [vmem:[#allocation5 + $0x158] sm:$0xff]  ;;  %v105_v22 = vld [vmem:[#allocation5 + $0x1d0] sm:$0xff]  ;;  %p536_p0 = pnand %p535_p13, %p529_p10 }
  0x22   :  { %418 = vmatpush3.msra.mxu1 %v92_v12  ;;  %385 = vmatpush3.msra.mxu0 %v59_v13  ;;  %v72_v23 = vld [vmem:[#allocation5 + $0xc8] sm:$0xff]  ;;  %v89_v24 = vld [vmem:[#allocation5 + $0x150] sm:$0xff]  ;;  %v71_v27 = vld [vmem:[#allocation5 + $0xc0] sm:$0xff] }
  0x23   :  { %419 = vmatprep.subr.mxu1 %v107_v14  ;;  %386 = vmatprep.subr.mxu0 %v74_v15  ;;  %v56_v25 = vld [vmem:[#allocation5 + $0x48] sm:$0xff]  ;;  %v55_v29 = vld [vmem:[#allocation5 + $0x40] sm:$0xff]  ;;  %v70_v31 = vld [vmem:[#allocation5 + $0xb8] sm:$0xff] }
  0x24   :  { %420 = vmatpush3.msra.mxu1 %v91_v16  ;;  %387 = vmatpush3.msra.mxu0 %v58_v17  ;;  %v104_v26 = vld [vmem:[#allocation5 + $0x1c8] sm:$0xff]  ;;  %v103_v30 = vld [vmem:[#allocation5 + $0x1c0] sm:$0xff]  ;;  %v54_v33 = vld [vmem:[#allocation5 + $0x38] sm:$0xff] }
  0x25   :  { %421 = vmatprep.subr.mxu1 %v106_v18  ;;  %388 = vmatprep.subr.mxu0 %v73_v19  ;;  %v88_v28 = vld [vmem:[#allocation5 + $0x148] sm:$0xff]  ;;  %v87_v32 = vld [vmem:[#allocation5 + $0x140] sm:$0xff]  ;;  %v102_v34 = vld [vmem:[#allocation5 + $0x1b8] sm:$0xff] }
  0x26   :  { %422 = vmatpush3.msra.mxu1 %v90_v20  ;;  %389 = vmatpush3.msra.mxu0 %v57_v21  ;;  %v69_v35 = vld [vmem:[#allocation5 + $0xb0] sm:$0xff]  ;;  %v86_v36 = vld [vmem:[#allocation5 + $0x138] sm:$0xff]  ;;  %v68_v39 = vld [vmem:[#allocation5 + $0xa8] sm:$0xff] }
  0x27   :  { %423 = vmatprep.subr.mxu1 %v105_v22  ;;  %390 = vmatprep.subr.mxu0 %v72_v23  ;;  %v53_v37 = vld [vmem:[#allocation5 + $0x30] sm:$0xff]  ;;  %v52_v41 = vld [vmem:[#allocation5 + $0x28] sm:$0xff]  ;;  %v67_v43 = vld [vmem:[#allocation5 + $0xa0] sm:$0xff] }
  0x28   :  { %424 = vmatpush3.msra.mxu1 %v89_v24  ;;  %391 = vmatpush3.msra.mxu0 %v56_v25  ;;  %v101_v38 = vld [vmem:[#allocation5 + $0x1b0] sm:$0xff]  ;;  %v100_v42 = vld [vmem:[#allocation5 + $0x1a8] sm:$0xff]  ;;  %v51_v45 = vld [vmem:[#allocation5 + $0x20] sm:$0xff] }
  0x29   :  { %425 = vmatprep.subr.mxu1 %v104_v26  ;;  %392 = vmatprep.subr.mxu0 %v71_v27  ;;  %v85_v40 = vld [vmem:[#allocation5 + $0x130] sm:$0xff]  ;;  %v84_v44 = vld [vmem:[#allocation5 + $0x128] sm:$0xff]  ;;  %v99_v46 = vld [vmem:[#allocation5 + $0x1a0] sm:$0xff] }
  0x2a   :  { %426 = vmatpush3.msra.mxu1 %v88_v28  ;;  %393 = vmatpush3.msra.mxu0 %v55_v29  ;;  %v66_v47 = vld [vmem:[#allocation5 + $0x98] sm:$0xff]  ;;  %v83_v48 = vld [vmem:[#allocation5 + $0x120] sm:$0xff]  ;;  %v65_v51 = vld [vmem:[#allocation5 + $0x90] sm:$0xff] }
  0x2b   :  { %427 = vmatprep.subr.mxu1 %v103_v30  ;;  %394 = vmatprep.subr.mxu0 %v70_v31  ;;  %v50_v49 = vld [vmem:[#allocation5 + $0x18] sm:$0xff]  ;;  %v49_v53 = vld [vmem:[#allocation5 + $0x10] sm:$0xff]  ;;  %v64_v55 = vld [vmem:[#allocation5 + $0x88] sm:$0xff] }
  0x2c   :  { %428 = vmatpush3.msra.mxu1 %v87_v32  ;;  %395 = vmatpush3.msra.mxu0 %v54_v33  ;;  %v98_v50 = vld [vmem:[#allocation5 + $0x198] sm:$0xff]  ;;  %v97_v54 = vld [vmem:[#allocation5 + $0x190] sm:$0xff]  ;;  %v48_v57 = vld [vmem:[#allocation5 + $0x8] sm:$0xff] }
  0x2d   :  { %429 = vmatprep.subr.mxu1 %v102_v34  ;;  %396 = vmatprep.subr.mxu0 %v69_v35  ;;  %v82_v52 = vld [vmem:[#allocation5 + $0x118] sm:$0xff]  ;;  %v81_v56 = vld [vmem:[#allocation5 + $0x110] sm:$0xff]  ;;  %v96_v58 = vld [vmem:[#allocation5 + $0x188] sm:$0xff] }
  0x2e   :  { %430 = vmatpush3.msra.mxu1 %v86_v36  ;;  %397 = vmatpush3.msra.mxu0 %v53_v37  ;;  %v63_v59 = vld [vmem:[#allocation5 + $0x80] sm:$0xff]  ;;  %v42_v60 = vld [vmem:[#allocation2 + $0x8] sm:$0xff]  ;;  %v80_v62 = vld [vmem:[#allocation5 + $0x108] sm:$0xff] }
  0x2f   :  { %431 = vmatprep.subr.mxu1 %v101_v38  ;;  %398 = vmatprep.subr.mxu0 %v68_v39  ;;  %v47_v61 = vld [vmem:[#allocation5] sm:$0xff]  ;;  %v41_v63 = vld [vmem:[#allocation2] sm:$0xff]  ;;  %v142_v1 = vld [vmem:[#allocation5 + $0x2f8] sm:$0xff] }
  0x30   :  { %432 = vmatpush3.msra.mxu1 %v85_v40  ;;  %399 = vmatpush3.msra.mxu0 %v52_v41  ;;  %v95_v0 = vld [vmem:[#allocation5 + $0x180] sm:$0xff]  ;;  %v44_v3 = vld [vmem:[#allocation2 + $0x18] sm:$0xff]  ;;  %v126_v4 = vld [vmem:[#allocation5 + $0x278] sm:$0xff] }
  0x31   :  { %433 = vmatprep.subr.mxu1 %v100_v42  ;;  %400 = vmatprep.subr.mxu0 %v67_v43  ;;  %v79_v2 = vld [vmem:[#allocation5 + $0x100] sm:$0xff]  ;;  %v141_v6 = vld [vmem:[#allocation5 + $0x2f0] sm:$0xff]  ;;  %v46_v8 = vld [vmem:[#allocation2 + $0x28] sm:$0xff] }
  0x32   :  { %434 = vmatpush3.msra.mxu1 %v84_v44  ;;  %401 = vmatpush3.msra.mxu0 %v51_v45  ;;  %v43_v5 = vld [vmem:[#allocation2 + $0x10] sm:$0xff]  ;;  %v125_v7 = vld [vmem:[#allocation5 + $0x270] sm:$0xff]  ;;  %v140_v9 = vld [vmem:[#allocation5 + $0x2e8] sm:$0xff] }
  0x33   :  { %435 = vmatprep.subr.mxu1 %v99_v46  ;;  %402 = vmatprep.subr.mxu0 %v66_v47  ;;  %v124_v10 = vld [vmem:[#allocation5 + $0x268] sm:$0xff]  ;;  %v139_v11 = vld [vmem:[#allocation5 + $0x2e0] sm:$0xff]  ;;  %v138_v13 = vld [vmem:[#allocation5 + $0x2d8] sm:$0xff] }
  0x34   :  { %436 = vmatpush3.msra.mxu1 %v83_v48  ;;  %403 = vmatpush3.msra.mxu0 %v50_v49  ;;  %v123_v12 = vld [vmem:[#allocation5 + $0x260] sm:$0xff]  ;;  %v122_v14 = vld [vmem:[#allocation5 + $0x258] sm:$0xff]  ;;  %v137_v15 = vld [vmem:[#allocation5 + $0x2d0] sm:$0xff] }
  0x35   :  { %437 = vmatprep.subr.mxu1 %v98_v50  ;;  %404 = vmatprep.subr.mxu0 %v65_v51  ;;  %v121_v16 = vld [vmem:[#allocation5 + $0x250] sm:$0xff]  ;;  %v136_v17 = vld [vmem:[#allocation5 + $0x2c8] sm:$0xff]  ;;  %v135_v19 = vld [vmem:[#allocation5 + $0x2c0] sm:$0xff] }
  0x36   :  { %438 = vmatpush3.msra.mxu1 %v82_v52  ;;  %405 = vmatpush3.msra.mxu0 %v49_v53  ;;  %v120_v18 = vld [vmem:[#allocation5 + $0x248] sm:$0xff]  ;;  %v119_v20 = vld [vmem:[#allocation5 + $0x240] sm:$0xff]  ;;  %v134_v21 = vld [vmem:[#allocation5 + $0x2b8] sm:$0xff] }
  0x37   :  { %439 = vmatprep.subr.mxu1 %v97_v54  ;;  %406 = vmatprep.subr.mxu0 %v64_v55  ;;  %v118_v22 = vld [vmem:[#allocation5 + $0x238] sm:$0xff]  ;;  %v133_v23 = vld [vmem:[#allocation5 + $0x2b0] sm:$0xff]  ;;  %v132_v25 = vld [vmem:[#allocation5 + $0x2a8] sm:$0xff] }
  0x38   :  { %440 = vmatpush3.msra.mxu1 %v81_v56  ;;  %407 = vmatpush3.msra.mxu0 %v48_v57  ;;  %v117_v24 = vld [vmem:[#allocation5 + $0x230] sm:$0xff]  ;;  %v116_v26 = vld [vmem:[#allocation5 + $0x228] sm:$0xff]  ;;  %v131_v27 = vld [vmem:[#allocation5 + $0x2a0] sm:$0xff] }
  0x39   :  { %441 = vmatprep.subr.mxu1 %v96_v58  ;;  %408 = vmatprep.subr.mxu0 %v63_v59  ;;  %v115_v28 = vld [vmem:[#allocation5 + $0x220] sm:$0xff]  ;;  %v130_v29 = vld [vmem:[#allocation5 + $0x298] sm:$0xff]  ;;  %v129_v31 = vld [vmem:[#allocation5 + $0x290] sm:$0xff] }
  0x3a   :  { %214 = vmatprep.mubr.f32.mxu0 %v42_v60  ;;  %409 = vmatpush3.msra.mxu0 %v47_v61  ;;  %v114_v30 = vld [vmem:[#allocation5 + $0x218] sm:$0xff]  ;;  %v113_v32 = vld [vmem:[#allocation5 + $0x210] sm:$0xff]  ;;  %v128_v33 = vld [vmem:[#allocation5 + $0x288] sm:$0xff] }
  0x3b   :  { %442 = vmatpush3.msra.mxu1 %v80_v62  ;;  %215 = vmatmul.mubr.f32.vlgmr.msra.gmra.mxu0 %v41_v63  ;;  %v112_v34 = vld [vmem:[#allocation5 + $0x208] sm:$0xff]  ;;  %v127_v35 = vld [vmem:[#allocation5 + $0x280] sm:$0xff]  ;;  %v45_v37 = vld [vmem:[#allocation2 + $0x20] sm:$0xff] }
  0x3c   :  { %443 = vmatprep.subr.mxu1 %v95_v0  ;;  %448 = vmatprep.subr.mxu0 %v142_v1  ;;  %v111_v36 = vld [vmem:[#allocation5 + $0x200] sm:$0xff]  ;;  %v377_v42 = vld [vmem:[%s593_s2] ss:$0 sm:$0xff] }
  0x3d   :  { %444 = vmatpush3.msra.mxu1 %v79_v2  ;;  %284 = vmatprep.mubr.f32.mxu1 %v44_v3 }
  0x3e   :  { %449 = vmatpush3.msra.mxu0 %v126_v4  ;;  %285 = vmatmul.mubr.f32.vlgmr.msra.gmra.mxu1 %v43_v5 }
  0x3f   :  { %450 = vmatprep.subr.mxu0 %v141_v6  ;;  %354 = vmatprep.mubr.f32.mxu0 %v46_v8 }
  0x40   :  { %451 = vmatpush3.msra.mxu0 %v125_v7 }
  0x41   :  { %452 = vmatprep.subr.mxu0 %v140_v9 }
  0x42   :  { %453 = vmatpush3.msra.mxu0 %v124_v10 }
  0x43   :  { %454 = vmatprep.subr.mxu0 %v139_v11 }
  0x44   :  { %455 = vmatpush3.msra.mxu0 %v123_v12 }
  0x45   :  { %456 = vmatprep.subr.mxu0 %v138_v13 }
  0x46   :  { %457 = vmatpush3.msra.mxu0 %v122_v14 }
  0x47   :  { %458 = vmatprep.subr.mxu0 %v137_v15 }
  0x48   :  { %459 = vmatpush3.msra.mxu0 %v121_v16 }
  0x49   :  { %460 = vmatprep.subr.mxu0 %v136_v17 }
  0x4a   :  { %461 = vmatpush3.msra.mxu0 %v120_v18 }
  0x4b   :  { %462 = vmatprep.subr.mxu0 %v135_v19 }
  0x4c   :  { %463 = vmatpush3.msra.mxu0 %v119_v20 }
  0x4d   :  { %464 = vmatprep.subr.mxu0 %v134_v21 }
  0x4e   :  { %465 = vmatpush3.msra.mxu0 %v118_v22 }
  0x4f   :  { %466 = vmatprep.subr.mxu0 %v133_v23 }
  0x50   :  { %467 = vmatpush3.msra.mxu0 %v117_v24 }
  0x51   :  { %468 = vmatprep.subr.mxu0 %v132_v25 }
  0x52   :  { %469 = vmatpush3.msra.mxu0 %v116_v26 }
  0x53   :  { %470 = vmatprep.subr.mxu0 %v131_v27 }
  0x54   :  { %471 = vmatpush3.msra.mxu0 %v115_v28 }
  0x55   :  { %472 = vmatprep.subr.mxu0 %v130_v29 }
  0x56   :  { %473 = vmatpush3.msra.mxu0 %v114_v30 }
  0x57   :  { %474 = vmatprep.subr.mxu0 %v129_v31 }
  0x58   :  { %475 = vmatpush3.msra.mxu0 %v113_v32 }
  0x59   :  { %476 = vmatprep.subr.mxu0 %v128_v33 }
  0x5a   :  { %477 = vmatpush3.msra.mxu0 %v112_v34 }
  0x5b   :  { %478 = vmatprep.subr.mxu0 %v127_v35 }
  0x5c   :  { %479 = vmatpush3.msra.mxu0 %v111_v36 }
  0x5d   :  { %355 = vmatmul.mubr.f32.vlgmr.msra.gmra.mxu0 %v45_v37 }
  0xfb   :  { %v410_v38 = vpop.f32.mrf.mxu0 }
  0xfd   :  { %v411_v39 = vpop.f32.mrf.mxu0 }
  0xfe   :  { %v445_v40 = vpop.f32.mrf.mxu1  ;;  %v412_v41 = vadd.f32 %v411_v39, %v410_v38 }
 0x100   :  { %v446_v43 = vpop.f32.mrf.mxu1  ;;  %v217_v44 = vadd.f32 %v412_v41, %v377_v42 }
 0x101   :  { %v447_v45 = vadd.f32 %v446_v43, %v445_v40 }
 0x103   :  { %v287_v48 = vadd.f32 %v447_v45, %v217_v44 }
 0x11d   :  { %v480_v46 = vpop.f32.mrf.mxu0 }
 0x11f   :  { %v481_v47 = vpop.f32.mrf.mxu0 }
 0x120   :  { %v482_v49 = vadd.f32 %v481_v47, %v480_v46 }
 0x122   :  { %v357_v50 = vadd.f32 %v482_v49, %v287_v48 }
 0x124   :  { %360 = vst [vmem:[#allocation7] sm:$0xff] %v357_v50 }
 0x125   :  { %539 = shalt.err (!%p536_p0)
}
 0x126   :  { %370 = dma.vmem_to_hbm [thread:$0]  %s368_s25, 128, %s594_s3, [#allocation4]  }
 0x127   :  { %552 = dma.done.wait [#allocation4], 128  }
 0x128   :  { %553 = vsyncadd [#allocation4], 4294967168 }
 0x129   :  { %374 = vsyncpa [#allocation3], 1 }
 0x12a   :  { %375 = vsyncpa [#allocation6], 1 }
 0x12b   :  { %376 = vsyncpa [#allocation4], 1 }

</bundles_post_ra>
